<compile_context>
chip_gen: v7x
topology: tpu7x:2x2x1
jax: 0.10.0
libtpu: 0.0.40
codegen_flags: <defaults>
</compile_context>

<pallas_src>
import functools
import math

import jax
import jax.numpy as jnp
from jax import lax
from jax.experimental import pallas as pl
from jax.experimental.pallas import tpu as pltpu


def _round_up(x, m):
    return ((x + m - 1) // m) * m


def _ntxent_kernel(qids_ref, kids_ref, q_ref, k_ref,
                   loss_ref, valid_ref,
                   m_sc, eneg_sc, npos_sc, nneg_sc, loss_sc,
                   *, inv_temp, b_real):
    qi = pl.program_id(0)          # query block
    ps = pl.program_id(1)          # pass: 0 = row stats, 1 = positive terms
    ki = pl.program_id(2)          # key block (reduction axis)
    nk = pl.num_programs(2)

    tq = q_ref.shape[0]
    tk = k_ref.shape[0]

    # ---- init per-anchor accumulators at the start of each query block ----
    @pl.when((ps == 0) & (ki == 0))
    def _init():
        m_sc[...] = jnp.full(m_sc.shape, -1e30, jnp.float32)
        eneg_sc[...] = jnp.zeros(eneg_sc.shape, jnp.float32)
        npos_sc[...] = jnp.zeros(npos_sc.shape, jnp.float32)
        nneg_sc[...] = jnp.zeros(nneg_sc.shape, jnp.float32)
        loss_sc[...] = jnp.zeros(loss_sc.shape, jnp.float32)

    # ---- sim tile: keys on sublanes, queries on lanes ----------------------
    # Fold 1/temperature into the query operand; bf16 MXU inputs, f32 accum.
    q = (q_ref[...] * inv_temp).astype(jnp.bfloat16)        # [tq, D]
    k = k_ref[...].astype(jnp.bfloat16)                     # [tk, D]
    sim = lax.dot_general(k, q, (((1,), (1,)), ((), ())),
                          preferred_element_type=jnp.float32)  # [tk, tq] f32

    same = kids_ref[...] == qids_ref[...]                    # [tk,1]==[1,tq] -> [tk,tq]
    key_g = ki * tk + lax.broadcasted_iota(jnp.int32, (tk, tq), 0)
    qry_g = qi * tq + lax.broadcasted_iota(jnp.int32, (tk, tq), 1)
    key_valid = key_g < b_real                               # mask out padded keys
    not_diag = key_g != qry_g

    pos = same & not_diag & key_valid                        # positives (same id, not self)
    neg = jnp.logical_not(same) & key_valid                  # negatives (different id)
    contrib = not_diag & key_valid                           # = pos | neg

    # ---- pass 0: online max / sum-exp over negatives + validity counts -----
    @pl.when(ps == 0)
    def _stats():
        tile_max = jnp.max(jnp.where(contrib, sim, -1e30), axis=0, keepdims=True)  # [1,tq]
        m_new = jnp.maximum(m_sc[...], tile_max)
        rescale = jnp.exp(m_sc[...] - m_new)
        e_tile = jnp.sum(jnp.where(neg, jnp.exp(sim - m_new), 0.0),
                         axis=0, keepdims=True)
        eneg_sc[...] = eneg_sc[...] * rescale + e_tile
        npos_sc[...] = npos_sc[...] + jnp.sum(pos.astype(jnp.float32), axis=0, keepdims=True)
        nneg_sc[...] = nneg_sc[...] + jnp.sum(neg.astype(jnp.float32), axis=0, keepdims=True)
        m_sc[...] = m_new

    # ---- pass 1: accumulate positive-pair terms (m, e_neg are now final) ---
    @pl.when(ps == 1)
    def _pos_terms():
        m_i = m_sc[...]
        e_neg = eneg_sc[...]
        # term(i,p) = logsumexp([sim_ip] ++ sim[i,negs]) - sim_ip
        #           = m_i + log(exp(sim_ip - m_i) + e_neg_i) - sim_ip
        # TODO(synk): if positives-per-anchor are known to be few, gather the
        # positive sims into a dense slab to cut the log() from O(B^2) to O(B)
        # EUP work (EUP is the saturating slot at large B).
        terms = (m_i + jnp.log(jnp.exp(sim - m_i) + e_neg)) - sim
        loss_sc[...] = loss_sc[...] + jnp.sum(jnp.where(pos, terms, 0.0),
                                              axis=0, keepdims=True)

        @pl.when(ki == nk - 1)
        def _finalize():
            anchor_in_range = (qi * tq + lax.broadcasted_iota(jnp.int32, (1, tq), 1)) < b_real
            valid = (npos_sc[...] > 0.0) & (nneg_sc[...] > 0.0) & anchor_in_range
            vf = valid.astype(jnp.float32)
            loss_ref[...] = (loss_sc[...] * vf).reshape(1, 1, tq)   # lane-dense store
            valid_ref[...] = vf.reshape(1, 1, tq)


def ntxent_loss_pallas(projections, image_ids, temperature=0.5,
                       tile_q=None, tile_k=None):
    """projections: [B, D] (assumed L2-normalized), image_ids: [B] int."""
    B, D = projections.shape
    d_pad = _round_up(D, 128)

    b128 = _round_up(B, 128)
    tq = tile_q if tile_q is not None else min(256, b128)   # v7x-safe defaults
    tk = tile_k if tile_k is not None else min(256, b128)
    lcm = tq * tk // math.gcd(tq, tk)
    b_pad = _round_up(B, lcm)
    num_q = b_pad // tq
    num_k = b_pad // tk

    # Zero-pad feature dim to a lane multiple and batch to a tile multiple.
    proj = jnp.zeros((b_pad, d_pad), jnp.float32)
    proj = proj.at[:B, :D].set(projections.astype(jnp.float32))
    ids = jnp.full((b_pad,), -1, jnp.int32).at[:B].set(image_ids.astype(jnp.int32))
    ids_row = ids.reshape(1, b_pad)      # query ids (lanes)
    ids_col = ids.reshape(b_pad, 1)      # key ids   (sublanes)

    kernel = functools.partial(_ntxent_kernel,
                               inv_temp=1.0 / float(temperature),
                               b_real=B)

    loss_rows, valid_rows = pl.pallas_call(
        kernel,
        out_shape=(
            jax.ShapeDtypeStruct((num_q, 1, tq), jnp.float32),
            jax.ShapeDtypeStruct((num_q, 1, tq), jnp.float32),
        ),
        grid_spec=pltpu.PrefetchScalarGridSpec(
            num_scalar_prefetch=0,
            grid=(num_q, 2, num_k),
            in_specs=[
                pl.BlockSpec((1, tq), lambda q, p, k: (0, q)),        # query ids
                pl.BlockSpec((tk, 1), lambda q, p, k: (k, 0)),        # key ids
                pl.BlockSpec((tq, d_pad), lambda q, p, k: (q, 0)),    # query projections
                pl.BlockSpec((tk, d_pad), lambda q, p, k: (k, 0)),    # key projections
            ],
            out_specs=(
                pl.BlockSpec((1, 1, tq), lambda q, p, k: (q, 0, 0)),
                pl.BlockSpec((1, 1, tq), lambda q, p, k: (q, 0, 0)),
            ),
            scratch_shapes=[
                pltpu.VMEM((1, tq), jnp.float32),   # running row max m_i
                pltpu.VMEM((1, tq), jnp.float32),   # sum exp over negatives
                pltpu.VMEM((1, tq), jnp.float32),   # positive count
                pltpu.VMEM((1, tq), jnp.float32),   # negative count
                pltpu.VMEM((1, tq), jnp.float32),   # per-anchor loss accumulator
            ],
        ),
        compiler_params=pltpu.CompilerParams(
            dimension_semantics=("parallel", "arbitrary", "arbitrary"),
            vmem_limit_bytes=32 * 1024 * 1024,
        ),
    )(ids_row, ids_col, proj, proj)

    # Trivial finalize as XLA epilogue (kept off the kernel critical path).
    n_valid = jnp.sum(valid_rows)
    total = jnp.sum(loss_rows)
    return jnp.where(n_valid > 0.0, total / jnp.maximum(n_valid, 1.0), 0.0)


def ntxent_loss_ref(projections, image_ids, temperature=0.5, mxu_bf16=False):
    """Pure-JAX reference with identical semantics (for correctness check)."""
    B = projections.shape[0]
    inv_t = 1.0 / float(temperature)
    if mxu_bf16:
        a = (projections * inv_t).astype(jnp.bfloat16)
        b = projections.astype(jnp.bfloat16)
        sim = jnp.dot(a, b.T, preferred_element_type=jnp.float32)
    else:
        sim = jnp.dot(projections, projections.T,
                      precision=lax.Precision.HIGHEST) * inv_t
    ids = image_ids.astype(jnp.int32)
    same = ids[:, None] == ids[None, :]
    eye = jnp.eye(B, dtype=bool)
    pos_mask = same & ~eye
    neg_mask = ~same
    m_i = jnp.max(jnp.where(~eye, sim, -1e30), axis=1, keepdims=True)
    exp_shift = jnp.exp(sim - m_i)
    e_neg = jnp.sum(jnp.where(neg_mask, exp_shift, 0.0), axis=1, keepdims=True)
    terms = m_i + jnp.log(exp_shift + e_neg) - sim
    loss_i = jnp.sum(jnp.where(pos_mask, terms, 0.0), axis=1, keepdims=True)
    valid = jnp.any(pos_mask, axis=1, keepdims=True) & jnp.any(neg_mask, axis=1, keepdims=True)
    n_valid = jnp.sum(valid.astype(jnp.float32))
    total = jnp.sum(jnp.where(valid, loss_i, 0.0))
    return jnp.where(n_valid > 0, total / jnp.maximum(n_valid, 1.0), 0.0)


if __name__ == "__main__":
    key = jax.random.PRNGKey(0)
    B, D = 8, 32  # small demo shapes: batch=8, projection dim=32

    x = jax.random.normal(key, (B, D), dtype=jnp.float32)
    projections = x / jnp.linalg.norm(x, axis=-1, keepdims=True)  # normalized embeddings
    image_ids = jnp.array([0, 0, 1, 1, 2, 2, 3, 7], dtype=jnp.int32)  # last two anchors have no positive

    loss = ntxent_loss_pallas(projections, image_ids, temperature=0.5)
    loss = jax.block_until_ready(loss)

    # Tight check against a reference that uses the same bf16-MXU quantization
    # (proves the tiled two-pass algorithm is exact).
    ref_bf16 = ntxent_loss_ref(projections, image_ids, temperature=0.5, mxu_bf16=True)
    assert jnp.allclose(loss, ref_bf16, rtol=1e-3, atol=1e-3), (loss, ref_bf16)

    # Looser check against the full-f32 reference (bf16 MXU quantization only).
    ref_f32 = ntxent_loss_ref(projections, image_ids, temperature=0.5)
    assert jnp.allclose(loss, ref_f32, rtol=2e-2, atol=2e-2), (loss, ref_f32)

    print("KERNEL_OK")
</pallas_src>

<mosaic_0001>
module attributes {stable_mosaic.version = 11 : i64} {
  func.func @_ntxent_kernel(%arg0: i32, %arg1: i32, %arg2: i32, %arg3: memref<1x128xi32, #tpu.memory_space<vmem>>, %arg4: memref<128x1xi32, #tpu.memory_space<vmem>>, %arg5: memref<128x128xf32, #tpu.memory_space<vmem>>, %arg6: memref<128x128xf32, #tpu.memory_space<vmem>>, %arg7: memref<1x1x128xf32, #tpu.memory_space<vmem>>, %arg8: memref<1x1x128xf32, #tpu.memory_space<vmem>>, %arg9: memref<1x128xf32, #tpu.memory_space<vmem>>, %arg10: memref<1x128xf32, #tpu.memory_space<vmem>>, %arg11: memref<1x128xf32, #tpu.memory_space<vmem>>, %arg12: memref<1x128xf32, #tpu.memory_space<vmem>>, %arg13: memref<1x128xf32, #tpu.memory_space<vmem>>) attributes {dimension_semantics = [#tpu.dimension_semantics<parallel>, #tpu.dimension_semantics<arbitrary>, #tpu.dimension_semantics<arbitrary>], iteration_bounds = array<i64: 1, 2, 1>, scalar_prefetch = 0 : i64, scratch_operands = 5 : i64, tpu.core_type = #tpu.core_type<tc>, window_params = [{transform_indices = @transform_0, window_bounds = array<i64: 1, 128>}, {transform_indices = @transform_1, window_bounds = array<i64: 128, 1>}, {transform_indices = @transform_2, window_bounds = array<i64: 128, 128>}, {transform_indices = @transform_3, window_bounds = array<i64: 128, 128>}, {transform_indices = @transform_4, window_bounds = array<i64: 1, 1, 128>}, {transform_indices = @transform_5, window_bounds = array<i64: 1, 1, 128>}]} {
    %c0_i32 = arith.constant 0 : i32
    %0 = arith.cmpi eq, %arg1, %c0_i32 : i32
    %c0_i32_0 = arith.constant 0 : i32
    %1 = arith.cmpi eq, %arg2, %c0_i32_0 : i32
    %2 = arith.andi %0, %1 : i1
    %3 = arith.extui %2 : i1 to i32
    %c0_i32_1 = arith.constant 0 : i32
    %4 = arith.cmpi ne, %3, %c0_i32_1 : i32
    scf.if %4 {
      %cst_15 = arith.constant -1.000000e+30 : f32
      %39 = vector.broadcast %cst_15 : f32 to vector<1x128xf32>
      %c0_16 = arith.constant 0 : index
      %c0_17 = arith.constant 0 : index
      %40 = vector.load %arg9[%c0_16, %c0_17] : memref<1x128xf32, #tpu.memory_space<vmem>>, vector<1x128xf32>
      tpu.vector_store %arg9[%c0_16, %c0_17], %39 {strides = array<i32>} : memref<1x128xf32, #tpu.memory_space<vmem>>, vector<1x128xf32>,
      %cst_18 = arith.constant 0.000000e+00 : f32
      %41 = vector.broadcast %cst_18 : f32 to vector<1x128xf32>
      %c0_19 = arith.constant 0 : index
      %c0_20 = arith.constant 0 : index
      %42 = vector.load %arg10[%c0_19, %c0_20] : memref<1x128xf32, #tpu.memory_space<vmem>>, vector<1x128xf32>
      tpu.vector_store %arg10[%c0_19, %c0_20], %41 {strides = array<i32>} : memref<1x128xf32, #tpu.memory_space<vmem>>, vector<1x128xf32>,
      %cst_21 = arith.constant 0.000000e+00 : f32
      %43 = vector.broadcast %cst_21 : f32 to vector<1x128xf32>
      %c0_22 = arith.constant 0 : index
      %c0_23 = arith.constant 0 : index
      %44 = vector.load %arg11[%c0_22, %c0_23] : memref<1x128xf32, #tpu.memory_space<vmem>>, vector<1x128xf32>
      tpu.vector_store %arg11[%c0_22, %c0_23], %43 {strides = array<i32>} : memref<1x128xf32, #tpu.memory_space<vmem>>, vector<1x128xf32>,
      %cst_24 = arith.constant 0.000000e+00 : f32
      %45 = vector.broadcast %cst_24 : f32 to vector<1x128xf32>
      %c0_25 = arith.constant 0 : index
      %c0_26 = arith.constant 0 : index
      %46 = vector.load %arg12[%c0_25, %c0_26] : memref<1x128xf32, #tpu.memory_space<vmem>>, vector<1x128xf32>
      tpu.vector_store %arg12[%c0_25, %c0_26], %45 {strides = array<i32>} : memref<1x128xf32, #tpu.memory_space<vmem>>, vector<1x128xf32>,
      %cst_27 = arith.constant 0.000000e+00 : f32
      %47 = vector.broadcast %cst_27 : f32 to vector<1x128xf32>
      %c0_28 = arith.constant 0 : index
      %c0_29 = arith.constant 0 : index
      %48 = vector.load %arg13[%c0_28, %c0_29] : memref<1x128xf32, #tpu.memory_space<vmem>>, vector<1x128xf32>
      tpu.vector_store %arg13[%c0_28, %c0_29], %47 {strides = array<i32>} : memref<1x128xf32, #tpu.memory_space<vmem>>, vector<1x128xf32>,
    } else {
    }
    %c0 = arith.constant 0 : index
    %c0_2 = arith.constant 0 : index
    %5 = vector.load %arg5[%c0, %c0_2] : memref<128x128xf32, #tpu.memory_space<vmem>>, vector<128x128xf32>
    %cst = arith.constant 2.000000e+00 : f32
    %6 = vector.broadcast %cst : f32 to vector<128x128xf32>
    %7 = arith.mulf %5, %6 : vector<128x128xf32>
    %8 = arith.truncf %7 : vector<128x128xf32> to vector<128x128xbf16>
    %c0_3 = arith.constant 0 : index
    %c0_4 = arith.constant 0 : index
    %9 = vector.load %arg6[%c0_3, %c0_4] : memref<128x128xf32, #tpu.memory_space<vmem>>, vector<128x128xf32>
    %10 = arith.truncf %9 : vector<128x128xf32> to vector<128x128xbf16>
    %cst_5 = arith.constant dense<0.000000e+00> : vector<128x128xf32>
    %11 = tpu.matmul %10, %8, %cst_5 {dimension_numbers = #tpu.dot_dimension_numbers<[1], [1], [0], [0], [0, 0, 1, 0], [], []>} : vector<128x128xbf16>, vector<128x128xbf16>, vector<128x128xf32> -> vector<128x128xf32>
    %c0_6 = arith.constant 0 : index
    %c0_7 = arith.constant 0 : index
    %12 = vector.load %arg4[%c0_6, %c0_7] : memref<128x1xi32, #tpu.memory_space<vmem>>, vector<128x1xi32>
    %c0_8 = arith.constant 0 : index
    %c0_9 = arith.constant 0 : index
    %13 = vector.load %arg3[%c0_8, %c0_9] : memref<1x128xi32, #tpu.memory_space<vmem>>, vector<1x128xi32>
    %14 = vector.broadcast %12 : vector<128x1xi32> to vector<128x128xi32>
    %15 = vector.broadcast %13 : vector<1x128xi32> to vector<128x128xi32>
    %16 = arith.cmpi eq, %14, %15 : vector<128x128xi32>
    %c128_i32 = arith.constant 128 : i32
    %17 = arith.muli %arg2, %c128_i32 : i32
    %18 = tpu.iota {dimensions = array<i32: 0>} : vector<128x128xi32>
    %19 = vector.broadcast %17 : i32 to vector<128x128xi32>
    %20 = arith.addi %19, %18 : vector<128x128xi32>
    %c128_i32_10 = arith.constant 128 : i32
    %21 = arith.muli %arg0, %c128_i32_10 : i32
    %22 = tpu.iota {dimensions = array<i32: 1>} : vector<128x128xi32>
    %23 = vector.broadcast %21 : i32 to vector<128x128xi32>
    %24 = arith.addi %23, %22 : vector<128x128xi32>
    %c8_i32 = arith.constant 8 : i32
    %25 = vector.broadcast %c8_i32 : i32 to vector<128x128xi32>
    %26 = arith.cmpi slt, %20, %25 : vector<128x128xi32>
    %27 = arith.cmpi ne, %20, %24 : vector<128x128xi32>
    %28 = arith.andi %16, %27 : vector<128x128xi1>
    %29 = arith.andi %28, %26 : vector<128x128xi1>
    %cst_11 = arith.constant dense<true> : vector<128x128xi1>
    %30 = arith.xori %16, %cst_11 : vector<128x128xi1>
    %31 = arith.andi %30, %26 : vector<128x128xi1>
    %32 = arith.andi %27, %26 : vector<128x128xi1>
    %c0_i32_12 = arith.constant 0 : i32
    %33 = arith.cmpi eq, %arg1, %c0_i32_12 : i32
    %34 = arith.extui %33 : i1 to i32
    %c0_i32_13 = arith.constant 0 : i32
    %35 = arith.cmpi ne, %34, %c0_i32_13 : i32
    scf.if %35 {
      %cst_15 = arith.constant -1.000000e+30 : f32
      %39 = vector.broadcast %cst_15 : f32 to vector<128x128xf32>
      %40 = arith.select %32, %11, %39 : vector<128x128xi1>, vector<128x128xf32>
      %cst_16 = arith.constant dense<0xFF800000> : vector<128xf32>
      %41 = vector.multi_reduction <maximumf>, %40, %cst_16 [0] : vector<128x128xf32> to vector<128xf32>
      %42 = vector.shape_cast %41 : vector<128xf32> to vector<1x128xf32>
      %c0_17 = arith.constant 0 : index
      %c0_18 = arith.constant 0 : index
      %43 = vector.load %arg9[%c0_17, %c0_18] : memref<1x128xf32, #tpu.memory_space<vmem>>, vector<1x128xf32>
      %44 = arith.maximumf %43, %42 : vector<1x128xf32>
      %c0_19 = arith.constant 0 : index
      %c0_20 = arith.constant 0 : index
      %45 = vector.load %arg9[%c0_19, %c0_20] : memref<1x128xf32, #tpu.memory_space<vmem>>, vector<1x128xf32>
      %46 = arith.subf %45, %44 : vector<1x128xf32>
      %47 = math.exp %46 : vector<1x128xf32>
      %48 = vector.broadcast %44 : vector<1x128xf32> to vector<128x128xf32>
      %49 = arith.subf %11, %48 : vector<128x128xf32>
      %50 = math.exp %49 : vector<128x128xf32>
      %cst_21 = arith.constant 0.000000e+00 : f32
      %51 = vector.broadcast %cst_21 : f32 to vector<128x128xf32>
      %52 = arith.select %31, %50, %51 : vector<128x128xi1>, vector<128x128xf32>
      %cst_22 = arith.constant dense<0.000000e+00> : vector<128xf32>
      %53 = vector.multi_reduction <add>, %52, %cst_22 [0] : vector<128x128xf32> to vector<128xf32>
      %54 = vector.shape_cast %53 : vector<128xf32> to vector<1x128xf32>
      %c0_23 = arith.constant 0 : index
      %c0_24 = arith.constant 0 : index
      %55 = vector.load %arg10[%c0_23, %c0_24] : memref<1x128xf32, #tpu.memory_space<vmem>>, vector<1x128xf32>
      %56 = arith.mulf %55, %47 : vector<1x128xf32>
      %57 = arith.addf %56, %54 : vector<1x128xf32>
      %c0_25 = arith.constant 0 : index
      %c0_26 = arith.constant 0 : index
      %58 = vector.load %arg10[%c0_25, %c0_26] : memref<1x128xf32, #tpu.memory_space<vmem>>, vector<1x128xf32>
      tpu.vector_store %arg10[%c0_25, %c0_26], %57 {strides = array<i32>} : memref<1x128xf32, #tpu.memory_space<vmem>>, vector<1x128xf32>,
      %c0_27 = arith.constant 0 : index
      %c0_28 = arith.constant 0 : index
      %59 = vector.load %arg11[%c0_27, %c0_28] : memref<1x128xf32, #tpu.memory_space<vmem>>, vector<1x128xf32>
      %60 = arith.extui %29 : vector<128x128xi1> to vector<128x128xi32>
      %61 = arith.sitofp %60 : vector<128x128xi32> to vector<128x128xf32>
      %cst_29 = arith.constant dense<0.000000e+00> : vector<128xf32>
      %62 = vector.multi_reduction <add>, %61, %cst_29 [0] : vector<128x128xf32> to vector<128xf32>
      %63 = vector.shape_cast %62 : vector<128xf32> to vector<1x128xf32>
      %64 = arith.addf %59, %63 : vector<1x128xf32>
      %c0_30 = arith.constant 0 : index
      %c0_31 = arith.constant 0 : index
      %65 = vector.load %arg11[%c0_30, %c0_31] : memref<1x128xf32, #tpu.memory_space<vmem>>, vector<1x128xf32>
      tpu.vector_store %arg11[%c0_30, %c0_31], %64 {strides = array<i32>} : memref<1x128xf32, #tpu.memory_space<vmem>>, vector<1x128xf32>,
      %c0_32 = arith.constant 0 : index
      %c0_33 = arith.constant 0 : index
      %66 = vector.load %arg12[%c0_32, %c0_33] : memref<1x128xf32, #tpu.memory_space<vmem>>, vector<1x128xf32>
      %67 = arith.extui %31 : vector<128x128xi1> to vector<128x128xi32>
      %68 = arith.sitofp %67 : vector<128x128xi32> to vector<128x128xf32>
      %cst_34 = arith.constant dense<0.000000e+00> : vector<128xf32>
      %69 = vector.multi_reduction <add>, %68, %cst_34 [0] : vector<128x128xf32> to vector<128xf32>
      %70 = vector.shape_cast %69 : vector<128xf32> to vector<1x128xf32>
      %71 = arith.addf %66, %70 : vector<1x128xf32>
      %c0_35 = arith.constant 0 : index
      %c0_36 = arith.constant 0 : index
      %72 = vector.load %arg12[%c0_35, %c0_36] : memref<1x128xf32, #tpu.memory_space<vmem>>, vector<1x128xf32>
      tpu.vector_store %arg12[%c0_35, %c0_36], %71 {strides = array<i32>} : memref<1x128xf32, #tpu.memory_space<vmem>>, vector<1x128xf32>,
      %c0_37 = arith.constant 0 : index
      %c0_38 = arith.constant 0 : index
      %73 = vector.load %arg9[%c0_37, %c0_38] : memref<1x128xf32, #tpu.memory_space<vmem>>, vector<1x128xf32>
      tpu.vector_store %arg9[%c0_37, %c0_38], %44 {strides = array<i32>} : memref<1x128xf32, #tpu.memory_space<vmem>>, vector<1x128xf32>,
    } else {
    }
    %c1_i32 = arith.constant 1 : i32
    %36 = arith.cmpi eq, %arg1, %c1_i32 : i32
    %37 = arith.extui %36 : i1 to i32
    %c0_i32_14 = arith.constant 0 : i32
    %38 = arith.cmpi ne, %37, %c0_i32_14 : i32
    scf.if %38 {
      %c0_15 = arith.constant 0 : index
      %c0_16 = arith.constant 0 : index
      %39 = vector.load %arg9[%c0_15, %c0_16] : memref<1x128xf32, #tpu.memory_space<vmem>>, vector<1x128xf32>
      %c0_17 = arith.constant 0 : index
      %c0_18 = arith.constant 0 : index
      %40 = vector.load %arg10[%c0_17, %c0_18] : memref<1x128xf32, #tpu.memory_space<vmem>>, vector<1x128xf32>
      %41 = vector.broadcast %39 : vector<1x128xf32> to vector<128x128xf32>
      %42 = arith.subf %11, %41 : vector<128x128xf32>
      %43 = math.exp %42 : vector<128x128xf32>
      %44 = vector.broadcast %40 : vector<1x128xf32> to vector<128x128xf32>
      %45 = arith.addf %43, %44 : vector<128x128xf32>
      %46 = math.log %45 : vector<128x128xf32>
      %47 = vector.broadcast %39 : vector<1x128xf32> to vector<128x128xf32>
      %48 = arith.addf %47, %46 : vector<128x128xf32>
      %49 = arith.subf %48, %11 : vector<128x128xf32>
      %c0_19 = arith.constant 0 : index
      %c0_20 = arith.constant 0 : index
      %50 = vector.load %arg13[%c0_19, %c0_20] : memref<1x128xf32, #tpu.memory_space<vmem>>, vector<1x128xf32>
      %cst_21 = arith.constant 0.000000e+00 : f32
      %51 = vector.broadcast %cst_21 : f32 to vector<128x128xf32>
      %52 = arith.select %29, %49, %51 : vector<128x128xi1>, vector<128x128xf32>
      %cst_22 = arith.constant dense<0.000000e+00> : vector<128xf32>
      %53 = vector.multi_reduction <add>, %52, %cst_22 [0] : vector<128x128xf32> to vector<128xf32>
      %54 = vector.shape_cast %53 : vector<128xf32> to vector<1x128xf32>
      %55 = arith.addf %50, %54 : vector<1x128xf32>
      %c0_23 = arith.constant 0 : index
      %c0_24 = arith.constant 0 : index
      %56 = vector.load %arg13[%c0_23, %c0_24] : memref<1x128xf32, #tpu.memory_space<vmem>>, vector<1x128xf32>
      tpu.vector_store %arg13[%c0_23, %c0_24], %55 {strides = array<i32>} : memref<1x128xf32, #tpu.memory_space<vmem>>, vector<1x128xf32>,
      %c0_i32_25 = arith.constant 0 : i32
      %57 = arith.cmpi eq, %arg2, %c0_i32_25 : i32
      %58 = arith.extui %57 : i1 to i32
      %c0_i32_26 = arith.constant 0 : i32
      %59 = arith.cmpi ne, %58, %c0_i32_26 : i32
      scf.if %59 {
        %c128_i32_27 = arith.constant 128 : i32
        %60 = arith.muli %arg0, %c128_i32_27 : i32
        %61 = tpu.iota {dimensions = array<i32: 1>} : vector<1x128xi32>
        %62 = vector.broadcast %60 : i32 to vector<1x128xi32>
        %63 = arith.addi %62, %61 : vector<1x128xi32>
        %c8_i32_28 = arith.constant 8 : i32
        %64 = vector.broadcast %c8_i32_28 : i32 to vector<1x128xi32>
        %65 = arith.cmpi slt, %63, %64 : vector<1x128xi32>
        %c0_29 = arith.constant 0 : index
        %c0_30 = arith.constant 0 : index
        %66 = vector.load %arg11[%c0_29, %c0_30] : memref<1x128xf32, #tpu.memory_space<vmem>>, vector<1x128xf32>
        %cst_31 = arith.constant 0.000000e+00 : f32
        %67 = vector.broadcast %cst_31 : f32 to vector<1x128xf32>
        %68 = arith.cmpf ogt, %66, %67 : vector<1x128xf32>
        %c0_32 = arith.constant 0 : index
        %c0_33 = arith.constant 0 : index
        %69 = vector.load %arg12[%c0_32, %c0_33] : memref<1x128xf32, #tpu.memory_space<vmem>>, vector<1x128xf32>
        %cst_34 = arith.constant 0.000000e+00 : f32
        %70 = vector.broadcast %cst_34 : f32 to vector<1x128xf32>
        %71 = arith.cmpf ogt, %69, %70 : vector<1x128xf32>
        %72 = arith.andi %68, %71 : vector<1x128xi1>
        %73 = arith.andi %72, %65 : vector<1x128xi1>
        %74 = arith.extui %73 : vector<1x128xi1> to vector<1x128xi32>
        %75 = arith.sitofp %74 : vector<1x128xi32> to vector<1x128xf32>
        %c0_35 = arith.constant 0 : index
        %c0_36 = arith.constant 0 : index
        %76 = vector.load %arg13[%c0_35, %c0_36] : memref<1x128xf32, #tpu.memory_space<vmem>>, vector<1x128xf32>
        %77 = arith.mulf %76, %75 : vector<1x128xf32>
        %78 = vector.shape_cast %77 : vector<1x128xf32> to vector<1x1x128xf32>
        %c0_37 = arith.constant 0 : index
        %c0_38 = arith.constant 0 : index
        %c0_39 = arith.constant 0 : index
        %79 = vector.load %arg7[%c0_37, %c0_38, %c0_39] : memref<1x1x128xf32, #tpu.memory_space<vmem>>, vector<1x1x128xf32>
        tpu.vector_store %arg7[%c0_37, %c0_38, %c0_39], %78 {strides = array<i32>} : memref<1x1x128xf32, #tpu.memory_space<vmem>>, vector<1x1x128xf32>,
        %80 = vector.shape_cast %75 : vector<1x128xf32> to vector<1x1x128xf32>
        %c0_40 = arith.constant 0 : index
        %c0_41 = arith.constant 0 : index
        %c0_42 = arith.constant 0 : index
        %81 = vector.load %arg8[%c0_40, %c0_41, %c0_42] : memref<1x1x128xf32, #tpu.memory_space<vmem>>, vector<1x1x128xf32>
        tpu.vector_store %arg8[%c0_40, %c0_41, %c0_42], %80 {strides = array<i32>} : memref<1x1x128xf32, #tpu.memory_space<vmem>>, vector<1x1x128xf32>,
      } else {
      }
    } else {
    }
    return
  }
  func.func @transform_0(%arg0: i32, %arg1: i32, %arg2: i32) -> (i32, i32) {
    %c0_i32 = arith.constant 0 : i32
    %c0_i32_0 = arith.constant 0 : i32
    return %c0_i32, %arg0 : i32, i32
  }
  func.func @transform_1(%arg0: i32, %arg1: i32, %arg2: i32) -> (i32, i32) {
    %c0_i32 = arith.constant 0 : i32
    %c0_i32_0 = arith.constant 0 : i32
    return %arg2, %c0_i32 : i32, i32
  }
  func.func @transform_2(%arg0: i32, %arg1: i32, %arg2: i32) -> (i32, i32) {
    %c0_i32 = arith.constant 0 : i32
    %c0_i32_0 = arith.constant 0 : i32
    return %arg0, %c0_i32 : i32, i32
  }
  func.func @transform_3(%arg0: i32, %arg1: i32, %arg2: i32) -> (i32, i32) {
    %c0_i32 = arith.constant 0 : i32
    %c0_i32_0 = arith.constant 0 : i32
    return %arg2, %c0_i32 : i32, i32
  }
  func.func @transform_4(%arg0: i32, %arg1: i32, %arg2: i32) -> (i32, i32, i32) {
    %c0_i32 = arith.constant 0 : i32
    %c0_i32_0 = arith.constant 0 : i32
    %c0_i32_1 = arith.constant 0 : i32
    return %arg0, %c0_i32, %c0_i32_0 : i32, i32, i32
  }
  func.func @transform_5(%arg0: i32, %arg1: i32, %arg2: i32) -> (i32, i32, i32) {
    %c0_i32 = arith.constant 0 : i32
    %c0_i32_0 = arith.constant 0 : i32
    %c0_i32_1 = arith.constant 0 : i32
    return %arg0, %c0_i32, %c0_i32_0 : i32, i32, i32
  }
}

</mosaic_0001>

<bundles_post_ra>
// kernel: tpu_custom_call.1
= control target key start
LH: loop header
LB: loop body
LE: loop exit
PB: predicated region body
PF: predicated region fallthrough
CT: control target
= control target key end

     0   :  { %11 = vsyncpa [#allocation8], 0  ;;  %s1830_s0 = inlined_call_operand.vmem [shape: s32[1,128], index: 0, kind: input, shape index: {}]   ;;  %s1831_s1 = inlined_call_operand.vmem [shape: s32[128,1], index: 1, kind: input, shape index: {}]   ;;  %s1832_s2 = inlined_call_operand.vmem [shape: f32[128,128], index: 2, kind: input, shape index: {}]   ;;  %s1833_s3 = inlined_call_operand.hbm [shape: f32[128,128], index: 3, kind: input, shape index: {}]   ;;  %s1834_s4 = inlined_call_operand.hbm [shape: f32[1,1,128], index: 4, kind: output, shape index: {0}]   ;;  %s1835_s5 = inlined_call_operand.hbm [shape: f32[1,1,128], index: 5, kind: output, shape index: {1}]  }
   0x1   :  { %12 = vsyncpa [#allocation9], 0 }
   0x2   :  { %13 = vsyncpa [#allocation12], 0  ;;  %s1609_s18 = smov 0   ;;  %s1611_s19 = smov 0  }
   0x3   :  { %s1613_s20 = smov 0  }
   0x4 LB: > { %s1298_s21 = sadd.s32 4294967295, %s1566_s20   ;;  %s34_s22 = sadd.s32 1, %s1562_s19  ;;  %s1566_s20 = sphi %s1613_s20, %s19_s20   ;;  %s1562_s19 = sphi %s1611_s19, %s1850_s19   ;;  %s1558_s18 = sphi %s1609_s18, %s1849_s18  }
   0x5   : > { %p36_p0 = scmp.ge.s32.totalorder %s34_s22, 2  ;;  %p1299_p1 = scmp.ge.s32.totalorder %s1566_s20, 1 }
   0x6   : > { %p199_p2 = scmp.lt.s32.totalorder %s1566_s20, 3  ;;  %p1636_p4 = scmp.eq.s32.totalorder %s1298_s21, 0 }
   0x7   : > { %s1852_s22 = smov (%p36_p0, %s34_s22), 0  ;;  %s1568_s25 = smov [#allocation7]  }
   0x8   : > { %p1630_p3 = pnand %p1299_p1, %p199_p2  ;;  %s238_s26 = sshll.u32 %s1568_s25, 4  ;;  %s239_s26 = int_to_ptr.vmem [resolvable:$true] %s238_s26 }
   0x9   : > { %s1840_s24 = scalar_select %p1636_p4, 1, 0 }
   0xa   : > { %s1839_s23 = scalar_select %p1630_p3, 1, 0 }
   0xb   : > { %p1398_p5 = pneg %p1630_p3  ;;  %s1452_s30 = scalar_lea.hbm %s1833_s3, 2048 }
   0xc   : > { %p1453_p7 = scmp.ne.s32.totalorder %s1833_s3, %s1452_s30  ;;  %p1459_p11 = scmp.lt.u32.totalorder %s1452_s30, %s1833_s3 }
   0xd   : > { %p1644_p6 = pnand %p1636_p4, %p1398_p5 }
   0xf   : > { %p1454_p8 = pneg %p1644_p6 }
  0x11   : > { %p1455_p9 = pnand %p1454_p8, %p1453_p7 }
  0x13   : > { %p1456_p10 = pneg %p1455_p9 }
  0x15   : > { %p1461_p12 = pnand %p1459_p11, %p1456_p10 }
  0x17   : > { %1464 = shalt.err (!%p1461_p12)
}
  0x18   : > { %s1465_s10 = scalar_lea.vmem %s239_s26, 2048  ;;  %p1473_p2 = scmp.lt.s32.totalorder %s239_s26, %s239_s26 }
  0x19   : > { %p1466_p13 = scmp.ne.s32.totalorder %s239_s26, %s1465_s10  ;;  %p1474_p5 = scmp.lt.s32.totalorder %s1465_s10, %s1465_s10 }
  0x1b   : > { %p1468_p0 = pnand %p1466_p13, %p1454_p8  ;;  %p1475_p4 = por %p1474_p5, %p1473_p2 }
  0x1d   : > { %p1469_p1 = pneg %p1468_p0 }
  0x1f   : > { %p1476_p3 = pnand %p1475_p4, %p1469_p1 }
  0x21   : > { %1479 = shalt.err (!%p1476_p3)
}
  0x22   : > { %s1569_s11 = smov 128   ;;  %s1570_s12 = smov 8  }
  0x23   : > { %1401 = dma.hbm_to_vmem [thread:$0]  (!%p1644_p6), %s1833_s3, 2048, %s239_s26, [#allocation8], %s1569_s11, %s1569_s11, %s1570_s12  }
  0x24   : > { %p1842_p7 = scmp.ne.s32.totalorder %s1839_s23, 0 }
  0x25   : > { %p1843_p9 = scmp.ne.s32.totalorder (!%p1842_p7), %s1840_s24, 0 }
  0x26   : > { %254 = sbr.rel (%p1842_p7) target bundleno = 505 (0x1f9), region = 36 }
  0x2d   : > { %1545 = dma.done.wait (%p1843_p9), [#allocation8], 2048  }
  0x2e   : > { %1547 = vsyncadd (%p1843_p9), [#allocation8], 4294965248  ;;  %p302_p4 = scmp.eq.s32.totalorder %s1558_s18, 0 }
  0x2f   : > { %v1571_v0 = vmov (%p302_p4), -1e+30   ;;  %v1572_v1 = vmov (%p302_p4), 0.0  }
  0x30   : > { %307 = sbr.rel (!%p302_p4) target bundleno = 55 (0x37), region = 44  ;;  %308 = vst [vmem:[#allocation2] sm:$0x1] (%p302_p4), %v1571_v0  ;;  %309 = vst [vmem:[#allocation3] sm:$0x1] (%p302_p4), %v1572_v1 }
  0x31   : > { %310 = vst [vmem:[#allocation4] sm:$0x1] (%p302_p4), %v1572_v1  ;;  %311 = vst [vmem:[#allocation5] sm:$0x1] (%p302_p4), %v1572_v1 }
  0x32   : > { %312 = vst [vmem:[#allocation6] sm:$0x1] (%p302_p4), %v1572_v1 }
  0x37 PF: > { %v313_v2 = vld [vmem:[%s1832_s2] sm:$0xff]  ;;  %v314_v3 = vld [vmem:[%s1832_s2 + $0x8] sm:$0xff]  ;;  %v315_v4 = vld [vmem:[%s1832_s2 + $0x10] sm:$0xff]  ;;  %v1573_v9 = vmov 0   ;;  %vm1574_vm2 = vmmov 1   ;;  %p1308_p3 = scmp.ne.s32.totalorder %s1558_s18, 0 }
  0x38   : > { %v329_v5 = vmul.f32 2.0, %v313_v2  ;;  %v330_v6 = vmul.f32 2.0, %v314_v3  ;;  %v316_v7 = vld [vmem:[%s1832_s2 + $0x18] sm:$0xff]  ;;  %v331_v8 = vmul.f32 2.0, %v315_v4  ;;  %1443 = vset.pattern.permute.xlu0 %v1573_v9  ;;  %v317_v13 = vld [vmem:[%s1832_s2 + $0x20] sm:$0xff]  ;;  %v318_v14 = vld [vmem:[%s1832_s2 + $0x28] sm:$0xff]  ;;  %v560_v4 = vlaneseq }
  0x39   : > { %v332_v10 = vmul.f32 2.0, %v316_v7  ;;  %v353_v15 = vld [vmem:[#allocation7] sm:$0xff]  ;;  %v354_v16 = vld [vmem:[#allocation7 + $0x8] sm:$0xff]  ;;  %v333_v20 = vmul.f32 2.0, %v317_v13  ;;  %v334_v21 = vmul.f32 2.0, %v318_v14  ;;  %v320_v26 = vld [vmem:[%s1832_s2 + $0x38] sm:$0xff] }
  0x3a   : > { %v345_v11 = vpack.c.bf16 %v330_v6, %v329_v5  ;;  %v369_v17 = vpack.c.bf16 %v354_v16, %v353_v15  ;;  %v361_v18 = vld [vmem:[#allocation7 + $0x40] sm:$0xff]  ;;  %v362_v19 = vld [vmem:[#allocation7 + $0x48] sm:$0xff]  ;;  %v336_v28 = vmul.f32 2.0, %v320_v26  ;;  %v324_v36 = vld [vmem:[%s1832_s2 + $0x58] sm:$0xff]  ;;  %v1725_v6 = vshrl.u32 %v560_v4, 7 }
  0x3b   : > { %v346_v12 = vpack.c.bf16 %v332_v10, %v331_v8  ;;  %v373_v22 = vpack.c.bf16 %v362_v19, %v361_v18  ;;  %v474_v23 = vld [vmem:[%s1831_s1] sm:$0xff]  ;;  %v347_v24 = vpack.c.bf16 %v334_v21, %v333_v20  ;;  %v319_v25 = vld [vmem:[%s1832_s2 + $0x30] sm:$0xff]  ;;  %v322_v31 = vld [vmem:[%s1832_s2 + $0x48] sm:$0xff]  ;;  %v340_v38 = vmul.f32 2.0, %v324_v36 }
  0x3c   : > { %1338 = vmatprep.subr.bf16.mxu0 %v345_v11  ;;  %1370 = vmatprep.subr.bf16.mxu1 %v345_v11  ;;  %v335_v27 = vmul.f32 2.0, %v319_v25  ;;  %v321_v30 = vld [vmem:[%s1832_s2 + $0x40] sm:$0xff]  ;;  %v338_v33 = vmul.f32 2.0, %v322_v31  ;;  %v323_v35 = vld [vmem:[%s1832_s2 + $0x50] sm:$0xff]  ;;  %v326_v41 = vld [vmem:[%s1832_s2 + $0x68] sm:$0xff]  ;;  %v1727_v7 = vand.u32 127, %v560_v4 }
  0x3d   : > { %1339 = vmatpush3.bf16.xpose.msra.mxu0 %v345_v11  ;;  %1378 = vmatpush3.bf16.xpose.msra.mxu1 %v345_v11  ;;  %v337_v32 = vmul.f32 2.0, %v321_v30  ;;  %v339_v37 = vmul.f32 2.0, %v323_v35  ;;  %v325_v40 = vld [vmem:[%s1832_s2 + $0x60] sm:$0xff]  ;;  %v342_v43 = vmul.f32 2.0, %v326_v41  ;;  %v327_v45 = vld [vmem:[%s1832_s2 + $0x70] sm:$0xff]  ;;  %v328_v46 = vld [vmem:[%s1832_s2 + $0x78] sm:$0xff] }
  0x3e   : > { %1340 = vmatprep.subr.bf16.mxu0 %v346_v12  ;;  %1371 = vmatprep.subr.bf16.mxu1 %v346_v12  ;;  %v348_v29 = vpack.c.bf16 %v336_v28, %v335_v27  ;;  %v341_v42 = vmul.f32 2.0, %v325_v40  ;;  %v343_v47 = vmul.f32 2.0, %v327_v45  ;;  %v344_v48 = vmul.f32 2.0, %v328_v46  ;;  %v355_v50 = vld [vmem:[#allocation7 + $0x10] sm:$0xff]  ;;  %v356_v51 = vld [vmem:[#allocation7 + $0x18] sm:$0xff]  ;;  %v357_v54 = vld [vmem:[#allocation7 + $0x20] sm:$0xff] }
  0x3f   : > { %1354 = vmatprep.mubr.bf16.mxu0 %v369_v17  ;;  %1362 = vmatprep.mubr.bf16.mxu1 %v373_v22  ;;  %v349_v34 = vpack.c.bf16 %v338_v33, %v337_v32  ;;  %v350_v39 = vpack.c.bf16 %v340_v38, %v339_v37  ;;  %v363_v52 = vld [vmem:[#allocation7 + $0x50] sm:$0xff]  ;;  %v364_v53 = vld [vmem:[#allocation7 + $0x58] sm:$0xff]  ;;  %v358_v55 = vld [vmem:[#allocation7 + $0x28] sm:$0xff]  ;;  %v370_v58 = vpack.c.bf16 %v356_v51, %v355_v50 }
  0x40   : > { %492 = vperm.xlu0 %1443, %v474_v23   ;;  %v351_v44 = vpack.c.bf16 %v342_v43, %v341_v42  ;;  %v352_v49 = vpack.c.bf16 %v344_v48, %v343_v47  ;;  %v365_v56 = vld [vmem:[#allocation7 + $0x60] sm:$0xff]  ;;  %v366_v57 = vld [vmem:[#allocation7 + $0x68] sm:$0xff]  ;;  %v374_v59 = vpack.c.bf16 %v364_v53, %v363_v52  ;;  %v371_v60 = vpack.c.bf16 %v358_v55, %v357_v54  ;;  %v359_v62 = vld [vmem:[#allocation7 + $0x30] sm:$0xff] }
  0x41   : > { %v375_v61 = vpack.c.bf16 %v366_v57, %v365_v56  ;;  %v360_v63 = vld [vmem:[#allocation7 + $0x38] sm:$0xff]  ;;  %v367_v0 = vld [vmem:[#allocation7 + $0x70] sm:$0xff]  ;;  %vm615_vm1 = vcmp.ne.s32.totalorder %v1725_v6, %v1727_v7 }
  0x42   : > { %v368_v1 = vld [vmem:[#allocation7 + $0x78] sm:$0xff]  ;;  %v372_v2 = vpack.c.bf16 %v360_v63, %v359_v62 }
  0x43   : > { %v376_v3 = vpack.c.bf16 %v368_v1, %v367_v0  ;;  %v1307_v5 = vld [vmem:[%s1830_s0] ss:$0 sm:$0xff]  ;;  %v851_v47 = vld [vmem:[#allocation4] sm:$0x1] (!%p1308_p3)  ;;  %v907_v48 = vld [vmem:[#allocation5] sm:$0x1] (!%p1308_p3) }
  0x44   : > { %v751_v57 = vld [vmem:[#allocation2] sm:$0x1] (!%p1308_p3) }
  0x45   : > { %1341 = vmatpush3.bf16.xpose.msra.mxu0 %v346_v12  ;;  %1379 = vmatpush3.bf16.xpose.msra.mxu1 %v346_v12 }
  0x46   : > { %1342 = vmatprep.subr.bf16.mxu0 %v347_v24  ;;  %1372 = vmatprep.subr.bf16.mxu1 %v347_v24 }
  0x4d   : > { %1343 = vmatpush3.bf16.xpose.msra.mxu0 %v347_v24  ;;  %1380 = vmatpush3.bf16.xpose.msra.mxu1 %v347_v24 }
  0x4e   : > { %1344 = vmatprep.subr.bf16.mxu0 %v348_v29  ;;  %1373 = vmatprep.subr.bf16.mxu1 %v348_v29 }
  0x55   : > { %1345 = vmatpush3.bf16.xpose.msra.mxu0 %v348_v29  ;;  %1381 = vmatpush3.bf16.xpose.msra.mxu1 %v348_v29  ;;  %v1575_v29 = vmov (!%p1308_p3), 0.0  }
  0x56   : > { %1346 = vmatprep.subr.bf16.mxu0 %v349_v34  ;;  %1374 = vmatprep.subr.bf16.mxu1 %v349_v34 }
  0x5d   : > { %1347 = vmatpush3.bf16.xpose.msra.mxu0 %v349_v34  ;;  %1382 = vmatpush3.bf16.xpose.msra.mxu1 %v349_v34 }
  0x5e   : > { %1348 = vmatprep.subr.bf16.mxu0 %v350_v39  ;;  %1375 = vmatprep.subr.bf16.mxu1 %v350_v39 }
  0x65   : > { %1349 = vmatpush3.bf16.xpose.msra.mxu0 %v350_v39  ;;  %1383 = vmatpush3.bf16.xpose.msra.mxu1 %v350_v39 }
  0x66   : > { %1350 = vmatprep.subr.bf16.mxu0 %v351_v44  ;;  %1376 = vmatprep.subr.bf16.mxu1 %v351_v44 }
  0x6d   : > { %1351 = vmatpush3.bf16.xpose.msra.mxu0 %v351_v44  ;;  %1384 = vmatpush3.bf16.xpose.msra.mxu1 %v351_v44 }
  0x6e   : > { %1352 = vmatprep.subr.bf16.mxu0 %v352_v49  ;;  %1377 = vmatprep.subr.bf16.mxu1 %v352_v49 }
  0x75   : > { %1353 = vmatpush3.bf16.xpose.msra.mxu0 %v352_v49  ;;  %1385 = vmatpush3.bf16.xpose.msra.mxu1 %v352_v49 }
  0x7c   : > { %1355 = vmatmul.mubr.bf16.vlgmr.msra.gmra.mrb[0].mxu0 %v370_v58  ;;  %1363 = vmatmul.mubr.bf16.vlgmr.msra.gmra.mrb[0].mxu1 %v374_v59  ;;  %v759_v59 = vsub.s32 (!%p1308_p3), 0, %v1725_v6 }
  0x7d   : > { %1358 = vmatprep.mubr.bf16.mxu0 %v371_v60  ;;  %1366 = vmatprep.mubr.bf16.mxu1 %v375_v61 }
  0x84   : > { %1359 = vmatmul.mubr.bf16.gmra.mrb[4].mxu0 %v372_v2  ;;  %1367 = vmatmul.mubr.bf16.gmra.mrb[4].mxu1 %v376_v3 }
  0xbf   : > { %v493_v8 = vpop.permute.xlu0 %492 }
  0xc0   : > { %vm543_vm0 = vcmp.eq.s32.totalorder %v493_v8, %v1307_v5 }
  0xc1   : > { %vm1731_vm3 = vmxor %vm543_vm0, %vm1574_vm2 }
  0xc2   : > { %vm1738_vm4 = vmand %vm543_vm0, %vm615_vm1  ;;  %v1310_v31 = vsel (!%p1308_p3), %vm1731_vm3, 1.0, %v1575_v29 }
  0xc3   : > { %v1309_v30 = vsel (!%p1308_p3), %vm1738_vm4, 1.0, %v1575_v29  ;;  %v955_v34 = vrot.slane (!%p1308_p3), %v1310_v31, 4 }
  0xc4   : > { %v899_v33 = vrot.slane (!%p1308_p3), %v1309_v30, 4 }
  0xc5   : > { %v956_v37 = vadd.f32 (!%p1308_p3), %v1310_v31, %v955_v34 }
  0xc6   : > { %v900_v36 = vadd.f32 (!%p1308_p3), %v1309_v30, %v899_v33 }
  0xc7   : > { %v957_v40 = vrot.slane (!%p1308_p3), %v956_v37, 2 }
  0xc8   : > { %v901_v39 = vrot.slane (!%p1308_p3), %v900_v36, 2 }
  0xc9   : > { %v958_v43 = vadd.f32 (!%p1308_p3), %v957_v40, %v956_v37 }
  0xca   : > { %v902_v42 = vadd.f32 (!%p1308_p3), %v901_v39, %v900_v36 }
  0xcb   : > { %v959_v46 = vrot.slane (!%p1308_p3), %v958_v43, 1 }
  0xcc   : > { %v903_v45 = vrot.slane (!%p1308_p3), %v902_v42, 1 }
  0xcd   : > { %v960_v51 = vadd.f32 (!%p1308_p3), %v959_v46, %v958_v43 }
  0xce   : > { %v904_v50 = vadd.f32 (!%p1308_p3), %v903_v45, %v902_v42 }
  0xcf   : > { %v961_v54 = vadd.f32 (!%p1308_p3), %v960_v51, %v907_v48 }
  0xd0   : > { %v905_v53 = vadd.f32 (!%p1308_p3), %v904_v50, %v851_v47 }
  0xd1   : > { %962 = vst [vmem:[#allocation5] sm:$0x1] (!%p1308_p3), %v961_v54 }
  0xd2   : > { %906 = vst [vmem:[#allocation4] sm:$0x1] (!%p1308_p3), %v905_v53 }
 0x14f   : > { %v1356_v11 = vpop.f32.mrb[0].mxu0  ;;  %v1364_v12 = vpop.f32.mrb[0].mxu1 }
 0x150   : > { %v1742_v13 = vpop.f32.mrb[1].mxu0  ;;  %v443_v14 = vpop.f32.mrb[1].mxu1  ;;  %v847_v12 = vld [vmem:[#allocation3] sm:$0x1] (!%p1308_p3) }
 0x151   : > { %v1357_v15 = vpop.f32.mrb[2].mxu0  ;;  %v1365_v16 = vpop.f32.mrb[2].mxu1  ;;  %v714_v27 = vsel (!%p1308_p3), %vm615_vm1, %v1742_v13, -1e+30 }
 0x152   : > { %v414_v17 = vpop.f32.mrb[3].mxu0  ;;  %v446_v18 = vpop.f32.mrb[3].mxu1  ;;  %v730_v28 = vmax.f32 (!%p1308_p3), %v714_v27, -1e+30 }
 0x154   : > { %713 = sbr.rel (%p1308_p3) target bundleno = 395 (0x18b), region = 48  ;;  %v734_v32 = vmax.f32 (!%p1308_p3), %v730_v28, -1e+30 }
 0x156   : > { %v738_v35 = vmax.f32 (!%p1308_p3), %v734_v32, -1e+30 }
 0x157   : > { %v1360_v19 = vpop.f32.mrb[4].mxu0  ;;  %v1368_v20 = vpop.f32.mrb[4].mxu1 }
 0x158   : > { %v427_v21 = vpop.f32.mrb[5].mxu0  ;;  %v459_v22 = vpop.f32.mrb[5].mxu1  ;;  %v742_v38 = vmax.f32 (!%p1308_p3), %v738_v35, -1e+30 }
 0x159   : > { %v1361_v23 = vpop.f32.mrb[6].mxu0  ;;  %v1369_v24 = vpop.f32.mrb[6].mxu1 }
 0x15a   : > { %v430_v25 = vpop.f32.mrb[7].mxu0  ;;  %v462_v26 = vpop.f32.mrb[7].mxu1  ;;  %v744_v41 = vmax.f32 (!%p1308_p3), %v742_v38, -1e+30 }
 0x15c   : > { %v745_v44 = vrot.slane %v744_v41, 4 }
 0x15e   : > { %v746_v49 = vmax.f32 %v744_v41, %v745_v44 }
 0x160   : > { %v747_v52 = vrot.slane %v746_v49, 2 }
 0x162   : > { %v748_v55 = vmax.f32 %v746_v49, %v747_v52 }
 0x164   : > { %v749_v56 = vrot.slane %v748_v55, 1 }
 0x166   : > { %v750_v58 = vmax.f32 %v748_v55, %v749_v56 }
 0x168   : > { %v752_v60 = vmax.f32 %v751_v57, %v750_v58 }
 0x16a   : > { %v760_v61 = vrot.slane %v752_v60, %v759_v59  ;;  %963 = vst [vmem:[#allocation2] sm:$0x1] %v752_v60  ;;  %v753_v0 = vsub.f32 %v751_v57, %v752_v60 }
 0x16c   : > { %v762_v62 = vsub.f32 %v1742_v13, %v760_v61  ;;  %v754_v1 = vmul.f32 1.442695, %v753_v0 }
 0x16e   : > { %v778_v63 = vmul.f32 1.442695, %v762_v62 }
 0x170   : > { %1444 = vpow2.f32 %v778_v63 }
 0x171   : > { %1446 = vpow2.f32 %v754_v1 }
 0x17a   : > { %v1445_v2 = vpop.eup %1444 }
 0x17b   : > { %v810_v3 = vsel %vm1731_vm3, %v1445_v2, 0.0  ;;  %v1447_v11 = vpop.eup %1446 }
 0x17c   : > { %v841_v4 = vrot.slane %v810_v3, 4  ;;  %v848_v15 = vmul.f32 %v1447_v11, %v847_v12 }
 0x17e   : > { %v842_v5 = vadd.f32 %v841_v4, %v810_v3 }
 0x180   : > { %v843_v8 = vrot.slane %v842_v5, 2 }
 0x182   : > { %v844_v6 = vadd.f32 %v843_v8, %v842_v5 }
 0x184   : > { %v845_v14 = vrot.slane %v844_v6, 1 }
 0x186   : > { %v846_v16 = vadd.f32 %v845_v14, %v844_v6 }
 0x188   : > { %v849_v17 = vadd.f32 %v848_v15, %v846_v16 }
 0x18a   : > { %850 = vst [vmem:[#allocation3] sm:$0x1] %v849_v17 }
 0x18b PF: > { %p1311_p6 = scmp.ne.s32.totalorder %s1558_s18, 1 }
 0x18c   : > { %v1312_v18 = vld [vmem:[#allocation2] ss:$0 sm:$0xff] (!%p1311_p6)  ;;  %vm1153_vm5 = vcmp.lt.s32.totalorder (!%p1311_p6), %v1727_v7, 8  ;;  %v1154_v9 = vld [vmem:[#allocation4] sm:$0x1] (!%p1311_p6)  ;;  %v1576_v22 = vmov (!%p1311_p6), 0.0  }
 0x18d   : > { %967 = sbr.rel (%p1311_p6) target bundleno = 457 (0x1c9), region = 52  ;;  %v976_v19 = vsub.f32 (!%p1311_p6), %v1742_v13, %v1312_v18  ;;  %v1156_v20 = vld [vmem:[#allocation5] sm:$0x1] (!%p1311_p6)  ;;  %vm1155_vm6 = vcmp.gt.f32.partialorder (!%p1311_p6), %v1154_v9, 0.0  ;;  %v1110_v36 = vld [vmem:[#allocation6] sm:$0x1] (!%p1311_p6) }
 0x18e   : > { %vm1157_vm7 = vcmp.gt.f32.partialorder (!%p1311_p6), %v1156_v20, 0.0 }
 0x18f   : > { %v992_v21 = vmul.f32 (!%p1311_p6), 1.442695, %v976_v19  ;;  %vm1158_vm8 = vmand (!%p1311_p6), %vm1155_vm6, %vm1157_vm7 }
 0x190   : > { %vm1159_vm9 = vmand (!%p1311_p6), %vm1158_vm8, %vm1153_vm5 }
 0x191   : > { %1448 = vpow2.f32 (!%p1311_p6), %v992_v21  ;;  %v1314_v23 = vsel (!%p1311_p6), %vm1159_vm9, 1.0, %v1576_v22  ;;  %v1313_v24 = vld [vmem:[#allocation3] ss:$0 sm:$0xff] (!%p1311_p6) }
 0x192   : > { %1165 = vst [vmem:[#allocation11] sm:$0x1] (!%p1311_p6), %v1314_v23 }
 0x19b   : > { %v1449_v25 = vpop.eup %1448 }
 0x19c   : > { %v1030_v26 = vadd.f32 %v1449_v25, %v1313_v24 }
 0x19e   : > { %1450 = vlog2.f32 %v1030_v26 }
 0x1a8   : > { %v1451_v27 = vpop.eup %1450 }
 0x1a9   : > { %v1047_v28 = vmul.f32 0.6931472, %v1451_v27 }
 0x1ab   : > { %v1078_v29 = vadd.f32 %v1312_v18, %v1047_v28 }
 0x1ad   : > { %v1094_v7 = vsub.f32 %v1078_v29, %v1742_v13 }
 0x1af   : > { %v1111_v30 = vsel %vm1738_vm4, %v1094_v7, 0.0 }
 0x1b0   : > { %v1142_v31 = vrot.slane %v1111_v30, 4 }
 0x1b2   : > { %v1143_v32 = vadd.f32 %v1142_v31, %v1111_v30 }
 0x1b4   : > { %v1144_v33 = vrot.slane %v1143_v32, 2 }
 0x1b6   : > { %v1145_v34 = vadd.f32 %v1144_v33, %v1143_v32 }
 0x1b8   : > { %v1146_v35 = vrot.slane %v1145_v34, 1 }
 0x1ba   : > { %v1147_v37 = vadd.f32 %v1146_v35, %v1145_v34 }
 0x1bc   : > { %v1148_v38 = vadd.f32 %v1147_v37, %v1110_v36 }
 0x1be   : > { %1149 = vst [vmem:[#allocation6] sm:$0x1] %v1148_v38 }
 0x1c5   : > { %v1162_v39 = vld [vmem:[#allocation6] sm:$0x1] }
 0x1c6   : > { %v1163_v40 = vmul.f32 %v1314_v23, %v1162_v39 }
 0x1c8   : > { %1164 = vst [vmem:[#allocation10] sm:$0x1] %v1163_v40 }
 0x1c9 PF: > { %p1765_p8 = scmp.eq.s32.totalorder %s1298_s21, 1  ;;  %s1577_s11 = smov [#allocation10]  }
 0x1ca   : > { %s1175_s12 = sshll.u32 %s1577_s11, 4  ;;  %s1578_s13 = smov [#allocation11]   ;;  %s1176_s12 = int_to_ptr.vmem [resolvable:$true] %s1175_s12 }
 0x1cb   : > { %s1188_s14 = sshll.u32 %s1578_s13, 4  ;;  %s1480_s15 = scalar_lea.vmem %s1176_s12, 16  ;;  %s1769_s14 = int_to_ptr.vmem [resolvable:$true] %s1188_s14 }
 0x1cc   : > { %p1481_p10 = scmp.ne.s32.totalorder %s1176_s12, %s1480_s15  ;;  %s1486_s16 = scalar_lea.vmem %s1176_s12, 32 }
 0x1cd   : > { %p1487_p13 = scmp.lt.s32.totalorder %s1176_s12, %s1176_s12  ;;  %p1488_p0 = scmp.lt.s32.totalorder %s1486_s16, %s1480_s15 }
 0x1ce   : > { %p1482_p11 = pnand %p1481_p10, %p1765_p8 }
 0x1cf   : > { %p1489_p1 = por %p1488_p0, %p1487_p13 }
 0x1d0   : > { %p1483_p12 = pneg %p1482_p11 }
 0x1d2   : > { %p1490_p2 = pnand %p1489_p1, %p1483_p12 }
 0x1d4   : > { %1493 = shalt.err (!%p1490_p2)
}
 0x1d5   : > { %s1494_s23 = scalar_lea.hbm %s1834_s4, 16 }
 0x1d6   : > { %p1495_p5 = scmp.ne.s32.totalorder %s1834_s4, %s1494_s23  ;;  %p1500_p4 = scmp.lt.u32.totalorder %s1494_s23, %s1834_s4 }
 0x1d8   : > { %p1496_p7 = pnand %p1495_p5, %p1765_p8 }
 0x1da   : > { %p1497_p9 = pneg %p1496_p7 }
 0x1dc   : > { %p1502_p3 = pnand %p1500_p4, %p1497_p9 }
 0x1de   : > { %1505 = shalt.err (!%p1502_p3)
}
 0x1df   : > { %1391 = dma.vmem_to_hbm [thread:$0]  (%p1765_p8), %s1176_s12, 16, %s1834_s4, [#allocation9]  }
 0x1e0   : > { %s1506_s30 = scalar_lea.vmem %s1769_s14, 16  ;;  %s1512_s6 = scalar_lea.vmem %s1769_s14, 32 }
 0x1e1   : > { %p1507_p6 = scmp.ne.s32.totalorder %s1769_s14, %s1506_s30  ;;  %p1513_p12 = scmp.lt.s32.totalorder %s1769_s14, %s1769_s14 }
 0x1e2   : > { %p1514_p13 = scmp.lt.s32.totalorder %s1512_s6, %s1506_s30 }
 0x1e3   : > { %p1508_p10 = pnand %p1507_p6, %p1765_p8 }
 0x1e4   : > { %p1515_p0 = por %p1514_p13, %p1513_p12 }
 0x1e5   : > { %p1509_p11 = pneg %p1508_p10 }
 0x1e7   : > { %p1516_p1 = pnand %p1515_p0, %p1509_p11 }
 0x1e9   : > { %1519 = shalt.err (!%p1516_p1)
}
 0x1ea   : > { %s1520_s9 = scalar_lea.hbm %s1835_s5, 16 }
 0x1eb   : > { %p1521_p2 = scmp.ne.s32.totalorder %s1835_s5, %s1520_s9  ;;  %p1526_p9 = scmp.lt.u32.totalorder %s1520_s9, %s1835_s5 }
 0x1ed   : > { %p1522_p5 = pnand %p1521_p2, %p1765_p8 }
 0x1ef   : > { %p1523_p7 = pneg %p1522_p5 }
 0x1f1   : > { %p1528_p4 = pnand %p1526_p9, %p1523_p7 }
 0x1f3   : > { %1531 = shalt.err (!%p1528_p4)
}
 0x1f4   : > { %1393 = dma.vmem_to_hbm [thread:$0]  (%p1765_p8), %s1769_s14, 16, %s1835_s5, [#allocation12]  }
 0x1f5   : > { %1549 = dma.done.wait (%p1765_p8), [#allocation9], 16  }
 0x1f6   : > { %1551 = vsyncadd (%p1765_p8), [#allocation9], 4294967280 }
 0x1f7   : > { %1553 = dma.done.wait (%p1765_p8), [#allocation12], 16  }
 0x1f8   : > { %1555 = vsyncadd (%p1765_p8), [#allocation12], 4294967280 }
 0x1f9 PF: > { %s19_s20 = sadd.s32 1, %s1566_s20   ;;  %s1849_s18 = smov %s1562_s19 }
 0x1fa   : > { %p16_p3 = scmp.ge.s32.totalorder %s19_s20, 4   ;;  %s1850_s19 = smov %s1852_s22 }
 0x1fc   :  { %18 = sbr.rel (!%p16_p3) target bundleno = 4 (0x4), region = 101 }
 0x203   :  { %1205 = vsyncpa [#allocation8], 1 }
 0x204   :  { %1207 = vsyncpa [#allocation8 + $0x1], 1 }
 0x205   :  { %1208 = vsyncpa [#allocation9], 1 }
 0x206   :  { %1210 = vsyncpa [#allocation9 + $0x1], 1 }
 0x207   :  { %1211 = vsyncpa [#allocation12], 1 }

</bundles_post_ra>
